<compile_context>
chip_gen: v6e
topology: v6e:2x2x1
jax: 0.10.0
libtpu: 0.0.40
codegen_flags: <defaults>
</compile_context>

<pallas_src>
import functools

import jax
import jax.numpy as jnp
from jax.experimental import pallas as pl
from jax.experimental.pallas import tpu as pltpu

LANES = 128
MAX_BLOCK_ROWS = 8192   # (8192,128) f32 = 4 MiB per input per buffer
CHUNK_ROWS = 256        # in-kernel strip: 32 vregs/input, keeps live ranges small


def _round_down(x, m):
    return (x // m) * m


def _focal_elementwise(p, t, gamma):
    """PyTorch-equivalent focal loss per element (f32), incl. -100 log clamp."""
    p = p.astype(jnp.float32)
    t = t.astype(jnp.float32)
    log_p = jnp.maximum(jnp.log(p), -100.0)
    log_1mp = jnp.maximum(jnp.log(1.0 - p), -100.0)
    bce = -(t * log_p + (1.0 - t) * log_1mp)
    pt = jnp.exp(-bce)
    return (1.0 - pt) ** gamma * bce


def _focal_loss_kernel(p_ref, t_ref, out_ref, acc_ref, *, gamma, rows,
                       block_rows, chunk_rows, blocks_per_split,
                       needs_mask, binary_targets):
    i = pl.program_id(1)

    @pl.when(i == 0)
    def _init():
        acc_ref[...] = jnp.zeros_like(acc_ref)

    # Unclamped global row offset of this block (phantom blocks -> fully masked).
    block_idx = pl.program_id(0) * blocks_per_split + i
    block_row0 = block_idx * block_rows

    def chunk_body(k, carry):
        off = pl.multiple_of(k * chunk_rows, 8)
        p = p_ref[pl.ds(off, chunk_rows), :].astype(jnp.float32)
        t = t_ref[pl.ds(off, chunk_rows), :].astype(jnp.float32)

        if binary_targets:
            # Fast path (1 transcendental/elem); only valid for t in {0, 1}.
            pt = jnp.where(t >= 0.5, p, 1.0 - p)
            bce = -jnp.maximum(jnp.log(pt), -100.0)
        else:
            # F.binary_cross_entropy(reduction='none') with PyTorch's -100 log clamp.
            log_p = jnp.maximum(jnp.log(p), -100.0)
            log_1mp = jnp.maximum(jnp.log(1.0 - p), -100.0)
            bce = -(t * log_p + (1.0 - t) * log_1mp)
            pt = jnp.exp(-bce)

        loss = (1.0 - pt) ** gamma * bce   # gamma is a Python int -> integer_pow

        if needs_mask:
            rid = jax.lax.broadcasted_iota(jnp.int32, (chunk_rows, LANES), 0)
            valid = (block_row0 + off + rid) < rows
            loss = jnp.where(valid, loss, 0.0)

        # Fold the strip onto one (8, LANES) vreg accumulator (pure VPU adds).
        acc_ref[...] += loss.reshape(chunk_rows // 8, 8, LANES).sum(axis=0)
        return carry

    n_chunks = block_rows // chunk_rows
    if n_chunks == 1:
        chunk_body(0, 0)
    else:
        jax.lax.fori_loop(0, n_chunks, chunk_body, 0)

    @pl.when(i == pl.num_programs(1) - 1)
    def _finalize():
        out_ref[...] = acc_ref[...]   # lane/sublane-dense (8,128) store


def focal_loss(inputs, targets, gamma=2, reduction="mean",
               assume_binary_targets=False):
    """Pallas TPU focal loss. Supports reduction in {'mean', 'sum'}."""
    # TODO(synk): reduction='none' (full elementwise output) not wired up.
    assert reduction in ("mean", "sum")
    if isinstance(gamma, float) and gamma.is_integer():
        gamma = int(gamma)   # keep (1-pt)**gamma an integer_pow (no extra exp/log)

    n_elem = int(inputs.size)
    flat_p = inputs.reshape(-1)
    flat_t = targets.reshape(-1)

    p_item = jnp.dtype(flat_p.dtype).itemsize
    t_item = jnp.dtype(flat_t.dtype).itemsize
    sub_mult = max(8, 32 // p_item, 32 // t_item)

    rows = n_elem // LANES
    n_main = rows * LANES
    rem = n_elem - n_main

    # Tiny inputs: a kernel launch is not worth it.
    if rows < 2 * sub_mult:
        total = jnp.sum(_focal_elementwise(flat_p, flat_t, gamma))
        return total / n_elem if reduction == "mean" else total

    # <128-element remainder handled with plain jnp (tiny).
    tail = jnp.float32(0.0)
    if rem:
        tail = jnp.sum(_focal_elementwise(flat_p[n_main:], flat_t[n_main:], gamma))
        # TODO(synk): this prefix slice is one extra HBM copy; it only happens
        # when n_elem is not a multiple of 128 (zero-copy for aligned sizes).
        flat_p = flat_p[:n_main]
        flat_t = flat_t[:n_main]

    p2 = flat_p.reshape(rows, LANES)
    t2 = flat_t.reshape(rows, LANES)

    if rows >= CHUNK_ROWS:
        chunk_rows = CHUNK_ROWS
        block_rows = min(MAX_BLOCK_ROWS, _round_down(rows, CHUNK_ROWS))
    else:
        chunk_rows = block_rows = _round_down(rows, sub_mult)

    n_blocks = pl.cdiv(rows, block_rows)
    n_split = 2 if n_blocks >= 2 else 1   # both v7x TensorCores; harmless on v5e/v6e
    blocks_per_split = pl.cdiv(n_blocks, n_split)
    total_blocks = n_split * blocks_per_split
    clamp_needed = total_blocks != n_blocks          # odd block count -> phantom block
    needs_mask = (total_blocks * block_rows) != rows  # partial tail or phantom block

    def in_map(c, i):
        blk = c * blocks_per_split + i
        if clamp_needed:
            blk = jnp.minimum(blk, n_blocks - 1)   # phantom re-reads last block (masked)
        return (blk, 0)

    kernel = functools.partial(
        _focal_loss_kernel, gamma=gamma, rows=rows, block_rows=block_rows,
        chunk_rows=chunk_rows, blocks_per_split=blocks_per_split,
        needs_mask=needs_mask, binary_targets=assume_binary_targets)

    n_trans = (1 if assume_binary_targets else 3) * n_main
    cost = pl.CostEstimate(
        flops=14 * n_main,
        transcendentals=n_trans,
        bytes_accessed=n_main * (p_item + t_item) + n_split * 8 * LANES * 4)

    partials = pl.pallas_call(
        kernel,
        out_shape=jax.ShapeDtypeStruct((n_split * 8, LANES), jnp.float32),
        grid_spec=pltpu.PrefetchScalarGridSpec(
            num_scalar_prefetch=0,
            grid=(n_split, blocks_per_split),
            in_specs=[
                pl.BlockSpec((block_rows, LANES), in_map),
                pl.BlockSpec((block_rows, LANES), in_map),
            ],
            out_specs=pl.BlockSpec((8, LANES), lambda c, i: (c, 0)),
            scratch_shapes=[pltpu.VMEM((8, LANES), jnp.float32)],
        ),
        compiler_params=pltpu.CompilerParams(
            dimension_semantics=("parallel", "arbitrary"),
            vmem_limit_bytes=32 * 1024 * 1024,
        ),
        cost_estimate=cost,
    )(p2, t2)

    total = jnp.sum(partials) + tail
    if reduction == "mean":
        total = total / n_elem
    return total


if __name__ == "__main__":
    key = jax.random.PRNGKey(0)
    k1, k2, k3, k4 = jax.random.split(key, 4)

    # Test 1: NCHW batch=2, channels=4, spatial=16 (2048 elems, lane-aligned).
    logits = jax.random.normal(k1, (2, 4, 16, 16), dtype=jnp.float32)
    inputs = jax.nn.sigmoid(logits)                       # probabilities in (0,1)
    targets = jax.random.bernoulli(k2, 0.5, (2, 4, 16, 16)).astype(jnp.float32)

    out = jax.block_until_ready(focal_loss(inputs, targets, gamma=2, reduction="mean"))
    ref = jnp.mean(_focal_elementwise(inputs, targets, 2))
    assert jnp.allclose(out, ref, rtol=1e-5, atol=1e-6), (out, ref)

    # Test 2: non-lane-aligned size -> 2-way split, in-kernel tail masking, jnp tail.
    shape2 = (2, 3, 50, 50)   # 15000 elements: 117 full rows + 24 remainder
    logits2 = jax.random.normal(k3, shape2, dtype=jnp.float32)
    inputs2 = jax.nn.sigmoid(logits2)
    targets2 = jax.random.bernoulli(k4, 0.5, shape2).astype(jnp.float32)

    out2 = jax.block_until_ready(focal_loss(inputs2, targets2, gamma=2, reduction="sum"))
    ref2 = jnp.sum(_focal_elementwise(inputs2, targets2, 2))
    assert jnp.allclose(out2, ref2, rtol=1e-4, atol=1e-4), (out2, ref2)

    print("KERNEL_OK")
</pallas_src>

<mosaic_0001>
module attributes {stable_mosaic.version = 11 : i64} {
  func.func @_focal_loss_kernel(%arg0: i32, %arg1: i32, %arg2: memref<16x128xf32, #tpu.memory_space<vmem>>, %arg3: memref<16x128xf32, #tpu.memory_space<vmem>>, %arg4: memref<8x128xf32, #tpu.memory_space<vmem>>, %arg5: memref<8x128xf32, #tpu.memory_space<vmem>>) attributes {dimension_semantics = [#tpu.dimension_semantics<parallel>, #tpu.dimension_semantics<arbitrary>], iteration_bounds = array<i64: 1, 1>, scalar_prefetch = 0 : i64, scratch_operands = 1 : i64, tpu.core_type = #tpu.core_type<tc>, window_params = [{transform_indices = @transform_0, window_bounds = array<i64: 16, 128>}, {transform_indices = @transform_1, window_bounds = array<i64: 16, 128>}, {transform_indices = @transform_2, window_bounds = array<i64: 8, 128>}]} {
    %c0_i32 = arith.constant 0 : i32
    %0 = arith.cmpi eq, %arg1, %c0_i32 : i32
    %1 = arith.extui %0 : i1 to i32
    %c0_i32_0 = arith.constant 0 : i32
    %2 = arith.cmpi ne, %1, %c0_i32_0 : i32
    scf.if %2 {
      %cst_16 = arith.constant 0.000000e+00 : f32
      %38 = vector.broadcast %cst_16 : f32 to vector<8x128xf32>
      %c0_17 = arith.constant 0 : index
      %c0_18 = arith.constant 0 : index
      %39 = vector.load %arg5[%c0_17, %c0_18] : memref<8x128xf32, #tpu.memory_space<vmem>>, vector<8x128xf32>
      tpu.vector_store %arg5[%c0_17, %c0_18], %38 {strides = array<i32>} : memref<8x128xf32, #tpu.memory_space<vmem>>, vector<8x128xf32>,
    } else {
    }
    %c0_i32_1 = arith.constant 0 : i32
    %3 = tpu.assume_multiple %c0_i32_1, 8 : i32
    %4 = arith.index_cast %3 : i32 to index
    %c0 = arith.constant 0 : index
    %5 = vector.load %arg2[%4, %c0] : memref<16x128xf32, #tpu.memory_space<vmem>>, vector<16x128xf32>
    %6 = arith.index_cast %3 : i32 to index
    %c0_2 = arith.constant 0 : index
    %7 = vector.load %arg3[%6, %c0_2] : memref<16x128xf32, #tpu.memory_space<vmem>>, vector<16x128xf32>
    %8 = math.log %5 : vector<16x128xf32>
    %cst = arith.constant -1.000000e+02 : f32
    %9 = vector.broadcast %cst : f32 to vector<16x128xf32>
    %10 = arith.maximumf %8, %9 : vector<16x128xf32>
    %cst_3 = arith.constant 1.000000e+00 : f32
    %11 = vector.broadcast %cst_3 : f32 to vector<16x128xf32>
    %12 = arith.subf %11, %5 : vector<16x128xf32>
    %13 = math.log %12 : vector<16x128xf32>
    %cst_4 = arith.constant -1.000000e+02 : f32
    %14 = vector.broadcast %cst_4 : f32 to vector<16x128xf32>
    %15 = arith.maximumf %13, %14 : vector<16x128xf32>
    %16 = arith.mulf %7, %10 : vector<16x128xf32>
    %cst_5 = arith.constant 1.000000e+00 : f32
    %17 = vector.broadcast %cst_5 : f32 to vector<16x128xf32>
    %18 = arith.subf %17, %7 : vector<16x128xf32>
    %19 = arith.mulf %18, %15 : vector<16x128xf32>
    %20 = arith.addf %16, %19 : vector<16x128xf32>
    %cst_6 = arith.constant 0.000000e+00 : f32
    %21 = vector.broadcast %cst_6 : f32 to vector<16x128xf32>
    %22 = arith.subf %21, %20 : vector<16x128xf32>
    %cst_7 = arith.constant 0.000000e+00 : f32
    %23 = vector.broadcast %cst_7 : f32 to vector<16x128xf32>
    %24 = arith.subf %23, %22 : vector<16x128xf32>
    %25 = math.exp %24 : vector<16x128xf32>
    %cst_8 = arith.constant 1.000000e+00 : f32
    %26 = vector.broadcast %cst_8 : f32 to vector<16x128xf32>
    %27 = arith.subf %26, %25 : vector<16x128xf32>
    %28 = arith.mulf %27, %27 : vector<16x128xf32>
    %29 = arith.mulf %28, %22 : vector<16x128xf32>
    %c0_9 = arith.constant 0 : index
    %c0_10 = arith.constant 0 : index
    %30 = vector.load %arg5[%c0_9, %c0_10] : memref<8x128xf32, #tpu.memory_space<vmem>>, vector<8x128xf32>
    %31 = vector.shape_cast %29 : vector<16x128xf32> to vector<2x8x128xf32>
    %cst_11 = arith.constant dense<0.000000e+00> : vector<8x128xf32>
    %32 = vector.multi_reduction <add>, %31, %cst_11 [0] : vector<2x8x128xf32> to vector<8x128xf32>
    %33 = arith.addf %30, %32 : vector<8x128xf32>
    %c0_12 = arith.constant 0 : index
    %c0_13 = arith.constant 0 : index
    %34 = vector.load %arg5[%c0_12, %c0_13] : memref<8x128xf32, #tpu.memory_space<vmem>>, vector<8x128xf32>
    tpu.vector_store %arg5[%c0_12, %c0_13], %33 {strides = array<i32>} : memref<8x128xf32, #tpu.memory_space<vmem>>, vector<8x128xf32>,
    %c0_i32_14 = arith.constant 0 : i32
    %35 = arith.cmpi eq, %arg1, %c0_i32_14 : i32
    %36 = arith.extui %35 : i1 to i32
    %c0_i32_15 = arith.constant 0 : i32
    %37 = arith.cmpi ne, %36, %c0_i32_15 : i32
    scf.if %37 {
      %c0_16 = arith.constant 0 : index
      %c0_17 = arith.constant 0 : index
      %38 = vector.load %arg5[%c0_16, %c0_17] : memref<8x128xf32, #tpu.memory_space<vmem>>, vector<8x128xf32>
      %c0_18 = arith.constant 0 : index
      %c0_19 = arith.constant 0 : index
      %39 = vector.load %arg4[%c0_18, %c0_19] : memref<8x128xf32, #tpu.memory_space<vmem>>, vector<8x128xf32>
      tpu.vector_store %arg4[%c0_18, %c0_19], %38 {strides = array<i32>} : memref<8x128xf32, #tpu.memory_space<vmem>>, vector<8x128xf32>,
    } else {
    }
    return
  }
  func.func @transform_0(%arg0: i32, %arg1: i32) -> (i32, i32) {
    %c1_i32 = arith.constant 1 : i32
    %0 = arith.muli %arg0, %c1_i32 : i32
    %1 = arith.addi %0, %arg1 : i32
    %c0_i32 = arith.constant 0 : i32
    %c0_i32_0 = arith.constant 0 : i32
    return %1, %c0_i32 : i32, i32
  }
  func.func @transform_1(%arg0: i32, %arg1: i32) -> (i32, i32) {
    %c1_i32 = arith.constant 1 : i32
    %0 = arith.muli %arg0, %c1_i32 : i32
    %1 = arith.addi %0, %arg1 : i32
    %c0_i32 = arith.constant 0 : i32
    %c0_i32_0 = arith.constant 0 : i32
    return %1, %c0_i32 : i32, i32
  }
  func.func @transform_2(%arg0: i32, %arg1: i32) -> (i32, i32) {
    %c0_i32 = arith.constant 0 : i32
    %c0_i32_0 = arith.constant 0 : i32
    return %arg0, %c0_i32 : i32, i32
  }
}

</mosaic_0001>

<bundles_post_ra>
// kernel: tpu_custom_call.1
= control target key start
LH: loop header
LB: loop body
LE: loop exit
PB: predicated region body
PF: predicated region fallthrough
CT: control target
= control target key end

     0   :  { %7 = vsyncpa [#allocation4], 0  ;;  %s234_s0 = inlined_call_operand.hbm [shape: f32[16,128], index: 0, kind: input, shape index: {}]   ;;  %s235_s1 = inlined_call_operand.hbm [shape: f32[16,128], index: 1, kind: input, shape index: {}]   ;;  %s236_s2 = inlined_call_operand.hbm [shape: f32[8,128], index: 2, kind: output, shape index: {}]  }
   0x1   :  { %8 = vsyncpa [#allocation7], 0 }
   0x2   :  { %9 = vsyncpa [#allocation5], 0  ;;  %s205_s9 = smov [#allocation3]  }
   0x3   :  { %s19_s10 = sshll.u32 %s205_s9, 4  ;;  %s20_s10 = int_to_ptr.vmem [resolvable:$true] %s19_s10 }
   0x4   :  { %s147_s11 = scalar_lea.vmem %s20_s10, 256  ;;  %p152_p1 = scmp.lt.s32.totalorder %s20_s10, %s20_s10 }
   0x5   :  { %p148_p0 = scmp.ne.s32.totalorder %s20_s10, %s147_s11  ;;  %p153_p2 = scmp.lt.s32.totalorder %s147_s11, %s147_s11 }
   0x7   :  { %p154_p3 = por %p153_p2, %p152_p1 }
   0x9   :  { %p155_p4 = pnand %p154_p3, %p148_p0 }
   0xb   :  { %158 = shalt.err (!%p155_p4)
}
   0xc   :  { %s206_s12 = smov 128   ;;  %s207_s13 = smov 8  }
   0xd   :  { %25 = dma.hbm_to_vmem [thread:$0]  %s234_s0, 256, %s20_s10, [#allocation4], %s206_s12, %s206_s12, %s207_s13  }
   0xe   :  { %s208_s16 = smov [#allocation6]  }
   0xf   :  { %s35_s17 = sshll.u32 %s208_s16, 4  ;;  %s36_s17 = int_to_ptr.vmem [resolvable:$true] %s35_s17 }
  0x10   :  { %s167_s18 = scalar_lea.vmem %s36_s17, 256  ;;  %p172_p6 = scmp.lt.s32.totalorder %s36_s17, %s36_s17 }
  0x11   :  { %p168_p5 = scmp.ne.s32.totalorder %s36_s17, %s167_s18  ;;  %p173_p7 = scmp.lt.s32.totalorder %s167_s18, %s167_s18 }
  0x13   :  { %p174_p8 = por %p173_p7, %p172_p6 }
  0x15   :  { %p175_p9 = pnand %p174_p8, %p168_p5 }
  0x17   :  { %178 = shalt.err (!%p175_p9)
}
  0x18   :  { %41 = dma.hbm_to_vmem [thread:$0]  %s235_s1, 256, %s36_s17, [#allocation7], %s206_s12, %s206_s12, %s207_s13  }
  0x19   :  { %199 = dma.done.wait [#allocation4], 256  }
  0x1a   :  { %200 = vsyncadd [#allocation4], 4294967040 }
  0x1b   :  { %201 = dma.done.wait [#allocation7], 256  }
  0x1c   :  { %202 = vsyncadd [#allocation7], 4294967040  ;;  %v57_v0 = vld [vmem:[#allocation3] sm:$0xff]  ;;  %v58_v1 = vld [vmem:[#allocation3 + $0x8] sm:$0xff]  ;;  %s209_s0 = smov [#allocation8]  }
  0x1d   :  { %127 = vlog2.f32 %v57_v0  ;;  %v67_v2 = vsub.f32 1.0, %v57_v0  ;;  %v68_v3 = vsub.f32 1.0, %v58_v1  ;;  %v59_v5 = vld [vmem:[#allocation6] sm:$0xff]  ;;  %v60_v7 = vld [vmem:[#allocation6 + $0x8] sm:$0xff]  ;;  %s112_s1 = sshll.u32 %s209_s0, 4  ;;  %s113_s1 = int_to_ptr.vmem [resolvable:$true] %s112_s1 }
  0x1e   :  { %129 = vlog2.f32 %v58_v1  ;;  %v77_v14 = vsub.f32 1.0, %v59_v5  ;;  %v78_v17 = vsub.f32 1.0, %v60_v7  ;;  %s179_s21 = scalar_lea.vmem %s113_s1, 128  ;;  %p184_p11 = scmp.lt.s32.totalorder %s113_s1, %s113_s1 }
  0x1f   :  { %131 = vlog2.f32 %v67_v2  ;;  %p180_p10 = scmp.ne.s32.totalorder %s113_s1, %s179_s21  ;;  %p185_p12 = scmp.lt.s32.totalorder %s179_s21, %s179_s21 }
  0x20   :  { %133 = vlog2.f32 %v68_v3 }
  0x21   :  { %p186_p13 = por %p185_p12, %p184_p11 }
  0x23   :  { %p187_p0 = pnand %p186_p13, %p180_p10 }
  0x2a   :  { %v128_v4 = vpop.eup %127 }
  0x2b   :  { %v130_v6 = vpop.eup %129  ;;  %v62_v8 = vmul.f32 0.6931472, %v128_v4 }
  0x2c   :  { %v132_v9 = vpop.eup %131  ;;  %v64_v10 = vmul.f32 0.6931472, %v130_v6 }
  0x2d   :  { %v134_v11 = vpop.eup %133  ;;  %v65_v12 = vmax.f32 %v62_v8, -100.0  ;;  %v70_v13 = vmul.f32 0.6931472, %v132_v9 }
  0x2e   :  { %v66_v15 = vmax.f32 %v64_v10, -100.0  ;;  %v72_v16 = vmul.f32 0.6931472, %v134_v11 }
  0x2f   :  { %v73_v18 = vmax.f32 %v70_v13, -100.0  ;;  %v75_v19 = vmul.f32 %v65_v12, %v59_v5 }
  0x30   :  { %v74_v20 = vmax.f32 %v72_v16, -100.0  ;;  %v76_v21 = vmul.f32 %v66_v15, %v60_v7 }
  0x31   :  { %v79_v22 = vmul.f32 %v77_v14, %v73_v18 }
  0x32   :  { %v80_v23 = vmul.f32 %v78_v17, %v74_v20 }
  0x33   :  { %v81_v24 = vadd.f32 %v79_v22, %v75_v19 }
  0x34   :  { %v82_v25 = vadd.f32 %v80_v23, %v76_v21 }
  0x35   :  { %v83_v26 = vsub.f32 0.0, %v81_v24 }
  0x36   :  { %v84_v27 = vsub.f32 0.0, %v82_v25 }
  0x37   :  { %v85_v28 = vsub.f32 0.0, %v83_v26 }
  0x38   :  { %v86_v29 = vsub.f32 0.0, %v84_v27 }
  0x39   :  { %v87_v30 = vmul.f32 1.442695, %v85_v28 }
  0x3a   :  { %v89_v31 = vmul.f32 1.442695, %v86_v29 }
  0x3b   :  { %135 = vpow2.f32 %v87_v30 }
  0x3c   :  { %137 = vpow2.f32 %v89_v31 }
  0x48   :  { %v136_v32 = vpop.eup %135 }
  0x49   :  { %v138_v33 = vpop.eup %137  ;;  %v91_v34 = vsub.f32 1.0, %v136_v32 }
  0x4a   :  { %v92_v35 = vsub.f32 1.0, %v138_v33 }
  0x4b   :  { %v93_v36 = vmul.f32 %v91_v34, %v91_v34 }
  0x4c   :  { %v94_v37 = vmul.f32 %v92_v35, %v92_v35 }
  0x4d   :  { %v95_v38 = vmul.f32 %v93_v36, %v83_v26 }
  0x4e   :  { %v96_v39 = vmul.f32 %v94_v37, %v84_v27 }
  0x50   :  { %v98_v40 = vadd.f32 %v96_v39, %v95_v38 }
  0x52   :  { %105 = vst [vmem:[#allocation8] sm:$0xff] %v98_v40 }
  0x53   :  { %190 = shalt.err (!%p187_p0)
}
  0x54   :  { %115 = dma.vmem_to_hbm [thread:$0]  %s113_s1, 128, %s236_s2, [#allocation5]  }
  0x55   :  { %203 = dma.done.wait [#allocation5], 128  }
  0x56   :  { %204 = vsyncadd [#allocation5], 4294967168 }
  0x57   :  { %119 = vsyncpa [#allocation4], 1 }
  0x58   :  { %120 = vsyncpa [#allocation7], 1 }
  0x59   :  { %121 = vsyncpa [#allocation5], 1 }

</bundles_post_ra>
